<compile_context>
chip_gen: v7x
topology: tpu7x:2x2x1
jax: 0.10.0
libtpu: 0.0.40
codegen_flags: <defaults>
</compile_context>

<pallas_src>
import math
import functools

import jax
import jax.numpy as jnp
from jax.experimental import pallas as pl
from jax.experimental.pallas import tpu as pltpu

LATENT_DIM = 56
LATENT_PAD = 64      # lane-friendlier K width for the MXU feed
HIDDEN = 128
DEFAULT_TB = 1024    # batch tile


def _round_up(x, m):
    return ((x + m - 1) // m) * m


def _property_predictor_kernel(z_ref, w1_ref, b1_ref, w2_ref, b2_ref, out_ref):
    # fc1 + ReLU: MXU matmul with f32 accumulation, bias-add + max on the VPU.
    h = jnp.dot(z_ref[...], w1_ref[...], preferred_element_type=jnp.float32)
    h = jnp.maximum(h + b1_ref[...], 0.0)                   # (TB,128) + (1,128)
    # fc2 (out_features == 1): VPU multiply + XLU lane reduce, not a matvec.
    y = jnp.sum(h * w2_ref[...], axis=-1, keepdims=True)    # (TB,1)
    out_ref[...] = (y + b2_ref[0, 0]).astype(out_ref.dtype)


@functools.partial(jax.jit, static_argnames=("tb",))
def property_predictor(z, w1, b1, w2, b2, *, tb=DEFAULT_TB):
    """z: (B, LATENT_DIM) f32 -> (B,) f32  (== fc2(relu(fc1(z))).squeeze(1))."""
    B, d = z.shape
    assert d == LATENT_DIM

    # Zero-pad latent dim (zero rows in w1 keep the result bit-equivalent math).
    z_p = jnp.pad(z.astype(jnp.float32), ((0, 0), (0, LATENT_PAD - d)))
    w1_p = jnp.pad(w1.astype(jnp.float32), ((0, LATENT_PAD - d), (0, 0)))
    b1_r = b1.reshape(1, HIDDEN).astype(jnp.float32)
    # w2 is a (128,1) column; flattening it to a (1,128) row keeps values/order.
    w2_r = w2.reshape(1, HIDDEN).astype(jnp.float32)
    b2_r = b2.reshape(1, 1).astype(jnp.float32)

    # Batch tiling: tile is a multiple of 8 (sublane), capped at `tb`.
    TB = min(tb, _round_up(B, 8))
    B_pad = _round_up(B, TB)
    if B_pad != B:
        z_p = jnp.pad(z_p, ((0, B_pad - B), (0, 0)))

    grid = (B_pad // TB,)

    out = pl.pallas_call(
        _property_predictor_kernel,
        out_shape=jax.ShapeDtypeStruct((B_pad, 1), jnp.float32),
        grid=grid,
        in_specs=[
            # z: tiled over batch -> pipelined (DMA of tile i+1 overlaps compute of i).
            pl.BlockSpec((TB, LATENT_PAD), lambda i: (i, 0)),
            # Weights / fc1 bias / fc2 row: constant index_map -> VMEM-resident.
            pl.BlockSpec((LATENT_PAD, HIDDEN), lambda i: (0, 0)),
            pl.BlockSpec((1, HIDDEN), lambda i: (0, 0)),
            pl.BlockSpec((1, HIDDEN), lambda i: (0, 0)),
            # fc2 bias scalar in SMEM.
            pl.BlockSpec((1, 1), lambda i: (0, 0), memory_space=pltpu.SMEM),
        ],
        out_specs=pl.BlockSpec((TB, 1), lambda i: (i, 0)),
        compiler_params=pltpu.CompilerParams(
            # Independent batch tiles: shard across TCs on v7x (no-op on v5e/v6e).
            dimension_semantics=("parallel",),
        ),
    )(z_p, w1_p, b1_r, w2_r, b2_r)

    return out[:B, 0]  # squeeze(1)


def init_params(key, latent_dim=LATENT_DIM, hidden=HIDDEN):
    """Deterministic init mimicking PyTorch nn.Linear default U(-1/sqrt(fan_in), +)."""
    k1, k2, k3, k4 = jax.random.split(key, 4)
    bound1 = 1.0 / math.sqrt(latent_dim)
    bound2 = 1.0 / math.sqrt(hidden)
    w1 = jax.random.uniform(k1, (latent_dim, hidden), jnp.float32, -bound1, bound1)
    b1 = jax.random.uniform(k2, (hidden,), jnp.float32, -bound1, bound1)
    w2 = jax.random.uniform(k3, (hidden, 1), jnp.float32, -bound2, bound2)
    b2 = jax.random.uniform(k4, (1,), jnp.float32, -bound2, bound2)
    return w1, b1, w2, b2


if __name__ == "__main__":
    key = jax.random.PRNGKey(0)
    kz, kp, kz2 = jax.random.split(key, 3)

    w1, b1, w2, b2 = init_params(kp)

    def ref_fn(z):
        return (jnp.maximum(z @ w1 + b1, 0.0) @ w2 + b2)[:, 0]

    # Small demo batch consistent with the module.
    B = 8
    z = jax.random.normal(kz, (B, LATENT_DIM), jnp.float32)
    out = jax.block_until_ready(property_predictor(z, w1, b1, w2, b2))
    assert out.shape == (B,)
    assert jnp.allclose(out, ref_fn(z), atol=1e-5, rtol=1e-5)

    # Larger, non-multiple-of-tile batch to exercise the grid + padding path.
    B2 = 2500
    z2 = jax.random.normal(kz2, (B2, LATENT_DIM), jnp.float32)
    out2 = jax.block_until_ready(property_predictor(z2, w1, b1, w2, b2))
    assert out2.shape == (B2,)
    assert jnp.allclose(out2, ref_fn(z2), atol=1e-4, rtol=1e-4)

    print("KERNEL_OK")
</pallas_src>

<mosaic_0001>
module attributes {stable_mosaic.version = 11 : i64} {
  func.func @_property_predictor_kernel(%arg0: i32, %arg1: memref<8x64xf32, #tpu.memory_space<vmem>>, %arg2: memref<64x128xf32, #tpu.memory_space<vmem>>, %arg3: memref<1x128xf32, #tpu.memory_space<vmem>>, %arg4: memref<1x128xf32, #tpu.memory_space<vmem>>, %arg5: memref<1x1xf32, #tpu.memory_space<smem>>, %arg6: memref<8x1xf32, #tpu.memory_space<vmem>>) attributes {dimension_semantics = [#tpu.dimension_semantics<parallel>], iteration_bounds = array<i64: 1>, scalar_prefetch = 0 : i64, scratch_operands = 0 : i64, tpu.core_type = #tpu.core_type<tc>, window_params = [{transform_indices = @transform_0, window_bounds = array<i64: 8, 64>}, {pipeline_mode = #tpu.pipeline_mode<synchronous>, transform_indices = @transform_1, window_bounds = array<i64: 64, 128>}, {pipeline_mode = #tpu.pipeline_mode<synchronous>, transform_indices = @transform_2, window_bounds = array<i64: 1, 128>}, {pipeline_mode = #tpu.pipeline_mode<synchronous>, transform_indices = @transform_3, window_bounds = array<i64: 1, 128>}, {transform_indices = @transform_4, window_bounds = array<i64: 1, 1>}, {transform_indices = @transform_5, window_bounds = array<i64: 8, 1>}]} {
    %c0 = arith.constant 0 : index
    %c0_0 = arith.constant 0 : index
    %0 = vector.load %arg1[%c0, %c0_0] : memref<8x64xf32, #tpu.memory_space<vmem>>, vector<8x64xf32>
    %c0_1 = arith.constant 0 : index
    %c0_2 = arith.constant 0 : index
    %1 = vector.load %arg2[%c0_1, %c0_2] : memref<64x128xf32, #tpu.memory_space<vmem>>, vector<64x128xf32>
    %cst = arith.constant dense<0.000000e+00> : vector<8x128xf32>
    %2 = tpu.matmul %0, %1, %cst {dimension_numbers = #tpu.dot_dimension_numbers<[1], [0], [0], [1], [0, 0, 1, 1], [], []>} : vector<8x64xf32>, vector<64x128xf32>, vector<8x128xf32> -> vector<8x128xf32>
    %c0_3 = arith.constant 0 : index
    %c0_4 = arith.constant 0 : index
    %3 = vector.load %arg3[%c0_3, %c0_4] : memref<1x128xf32, #tpu.memory_space<vmem>>, vector<1x128xf32>
    %4 = vector.broadcast %3 : vector<1x128xf32> to vector<8x128xf32>
    %5 = arith.addf %2, %4 : vector<8x128xf32>
    %cst_5 = arith.constant 0.000000e+00 : f32
    %6 = vector.broadcast %cst_5 : f32 to vector<8x128xf32>
    %7 = arith.maximumf %5, %6 : vector<8x128xf32>
    %c0_6 = arith.constant 0 : index
    %c0_7 = arith.constant 0 : index
    %8 = vector.load %arg4[%c0_6, %c0_7] : memref<1x128xf32, #tpu.memory_space<vmem>>, vector<1x128xf32>
    %9 = vector.broadcast %8 : vector<1x128xf32> to vector<8x128xf32>
    %10 = arith.mulf %7, %9 : vector<8x128xf32>
    %cst_8 = arith.constant dense<0.000000e+00> : vector<8xf32>
    %11 = vector.multi_reduction <add>, %10, %cst_8 [1] : vector<8x128xf32> to vector<8xf32>
    %12 = vector.shape_cast %11 : vector<8xf32> to vector<8x1xf32>
    %c0_9 = arith.constant 0 : index
    %c0_10 = arith.constant 0 : index
    %13 = memref.load %arg5[%c0_9, %c0_10] : memref<1x1xf32, #tpu.memory_space<smem>>
    %14 = vector.broadcast %13 : f32 to vector<8x1xf32>
    %15 = arith.addf %12, %14 : vector<8x1xf32>
    %c0_11 = arith.constant 0 : index
    %c0_12 = arith.constant 0 : index
    %16 = vector.load %arg6[%c0_11, %c0_12] : memref<8x1xf32, #tpu.memory_space<vmem>>, vector<8x1xf32>
    tpu.vector_store %arg6[%c0_11, %c0_12], %15 {strides = array<i32>} : memref<8x1xf32, #tpu.memory_space<vmem>>, vector<8x1xf32>,
    return
  }
  func.func @transform_0(%arg0: i32) -> (i32, i32) {
    %c0_i32 = arith.constant 0 : i32
    %c0_i32_0 = arith.constant 0 : i32
    return %arg0, %c0_i32 : i32, i32
  }
  func.func @transform_1(%arg0: i32) -> (i32, i32) {
    %c0_i32 = arith.constant 0 : i32
    %c0_i32_0 = arith.constant 0 : i32
    %c0_i32_1 = arith.constant 0 : i32
    return %c0_i32, %c0_i32_0 : i32, i32
  }
  func.func @transform_2(%arg0: i32) -> (i32, i32) {
    %c0_i32 = arith.constant 0 : i32
    %c0_i32_0 = arith.constant 0 : i32
    %c0_i32_1 = arith.constant 0 : i32
    return %c0_i32, %c0_i32_0 : i32, i32
  }
  func.func @transform_3(%arg0: i32) -> (i32, i32) {
    %c0_i32 = arith.constant 0 : i32
    %c0_i32_0 = arith.constant 0 : i32
    %c0_i32_1 = arith.constant 0 : i32
    return %c0_i32, %c0_i32_0 : i32, i32
  }
  func.func @transform_4(%arg0: i32) -> (i32, i32) {
    %c0_i32 = arith.constant 0 : i32
    %c0_i32_0 = arith.constant 0 : i32
    %c0_i32_1 = arith.constant 0 : i32
    return %c0_i32, %c0_i32_0 : i32, i32
  }
  func.func @transform_5(%arg0: i32) -> (i32, i32) {
    %c0_i32 = arith.constant 0 : i32
    %c0_i32_0 = arith.constant 0 : i32
    return %arg0, %c0_i32 : i32, i32
  }
}

</mosaic_0001>

<bundles_post_ra>
// kernel: property_predictor.1
= control target key start
LH: loop header
LB: loop body
LE: loop exit
PB: predicated region body
PF: predicated region fallthrough
CT: control target
= control target key end

     0   :  { %v177_v0 = vmov 0.0|0.0   ;;  %vm178_vm0 = vmmov 0   ;;  %v179_v4 = vmov 0.0   ;;  %vm37_vm1 = vcmask 523264   ;;  %s249_s1 = inlined_call_operand.vmem [shape: f32[64,128], index: 1, kind: input, shape index: {}]   ;;  %s250_s0 = inlined_call_operand.vmem [shape: f32[8,64], index: 0, kind: input, shape index: {}]   ;;  %s251_s2 = inlined_call_operand.vmem [shape: f32[1,128], index: 2, kind: input, shape index: {}]   ;;  %s252_s3 = inlined_call_operand.vmem [shape: f32[1,128], index: 3, kind: input, shape index: {}]   ;;  %s253_s4 = inlined_call_operand.<no memory space> [shape: f32[1,1], index: 4, kind: input, shape index: {}]   ;;  %s254_s5 = inlined_call_operand.vmem [shape: f32[8,1], index: 5, kind: output, shape index: {}]  }
   0x1   :  { %162 = vmatprep.subr.bf16.mxu0 %v177_v0  ;;  %v22_v1 = vld [vmem:[%s249_s1] sm:$0xff]  ;;  %v23_v2 = vld [vmem:[%s249_s1 + $0x8] sm:$0xff]  ;;  %v24_v3 = vld [vmem:[%s249_s1 + $0x10] sm:$0xff]  ;;  %159 = vmatprep.mubr.msk.f32.mxu0 %vm178_vm0, %v179_v4  ;;  %v123_v22 = vstv %s253_s4  ;;  %vm125_vm2 = vcmask 7168  }
   0x2   :  { %v163_v5 = vpack.c.bf16 %v23_v2, %v22_v1  ;;  %v25_v6 = vld [vmem:[%s249_s1 + $0x18] sm:$0xff]  ;;  %v26_v8 = vld [vmem:[%s249_s1 + $0x20] sm:$0xff]  ;;  %v27_v9 = vld [vmem:[%s249_s1 + $0x28] sm:$0xff] }
   0x3   :  { %v166_v7 = vpack.c.bf16 %v25_v6, %v24_v3  ;;  %v169_v10 = vpack.c.bf16 %v27_v9, %v26_v8  ;;  %v28_v11 = vld [vmem:[%s249_s1 + $0x30] sm:$0xff]  ;;  %v29_v12 = vld [vmem:[%s249_s1 + $0x38] sm:$0xff]  ;;  %v21_v14 = vld [vmem:[%s250_s0] sm:$0xff] }
   0x4   :  { %164 = vmatpush3.bf16.msra.mxu0 %v163_v5  ;;  %v172_v13 = vpack.c.bf16 %v29_v12, %v28_v11  ;;  %v131_v15 = vld [vmem:[%s251_s2] ss:$0 sm:$0xff] }
   0x5   :  { %165 = vmatprep.subr.bf16.mxu0 %v177_v0  ;;  %v133_v19 = vld [vmem:[%s252_s3] ss:$0 sm:$0xff] }
   0x8   :  { %167 = vmatpush3.bf16.msra.mxu0 %v166_v7 }
   0x9   :  { %168 = vmatprep.subr.bf16.mxu0 %v177_v0 }
   0xc   :  { %170 = vmatpush3.bf16.msra.mxu0 %v169_v10 }
   0xd   :  { %171 = vmatprep.subr.bf16.mxu0 %v177_v0 }
  0x10   :  { %173 = vmatpush3.bf16.msra.mxu0 %v172_v13 }
  0x13   :  { %160 = vmatmul.mubr.msk.f32.vlgmr.msra.gmra.mrb[0].mxu0 %vm37_vm1, %v21_v14 }
  0xe6   :  { %v107_v16 = vpop.f32.mrb[0].mxu0 }
  0xe7   :  { %v108_v17 = vadd.f32 %v131_v15, %v107_v16  ;;  %v161_v18 = vpop.f32.mrb[1].mxu0 }
  0xe9   :  { %v111_v20 = vmax.f32 %v108_v17, 0.0 }
  0xeb   :  { %v119_v21 = vmul.f32 %v133_v19, %v111_v20 }
  0xed   :  { %120 = vadd.xlane.f32.xlu0 %v119_v21 }
 0x17a   :  { %v121_v23 = vpop.xlane.xlu0 %120 }
 0x17b   :  { %v124_v24 = vadd.f32 %v123_v22, %v121_v23 }
 0x17d   :  { %126 = vst.msk [vmem:[%s254_s5] sm:$0xff] %vm125_vm2, %v124_v24 }

</bundles_post_ra>
